<compile_context>
chip_gen: v7x
topology: tpu7x:2x2x1
jax: 0.10.0
libtpu: 0.0.40
codegen_flags: <defaults>
</compile_context>

<pallas_src>
import functools

import jax
import jax.numpy as jnp
import numpy as np
from jax.experimental import pallas as pl
from jax.experimental.pallas import tpu as pltpu

_LANES = 128
_ROW_ALIGN = 32  # block-row multiple: covers f32 (8), bf16 (16), int8 (32) tiling


def _wce_kernel(x_ref, a_ref, num_ref, den_ref):
    """One grid step: (T, 128) interleaved logits + per-lane code -> (8, 128) partials."""
    x = x_ref[...].astype(jnp.float32)   # lane 2j: x0 of sample, lane 2j+1: x1
    a = a_ref[...].astype(jnp.float32)   # lane 2j: +w0 / -w1, elsewhere 0

    # Bring each sample's other-class logit onto its own lane.  The rolled
    # lane-iota picks whichever rotation delivers lane l+1 at lane l, so the
    # result is independent of the hardware rotate direction.  XLU is idle in
    # this kernel, so the extra roll is free.
    li = jax.lax.broadcasted_iota(jnp.int32, (1, _LANES), 1)
    roll_a_is_next = pltpu.roll(li, shift=1, axis=1) == li + 1          # (1, 128)
    partner = jnp.where(roll_a_is_next,
                        pltpu.roll(x, shift=1, axis=1),
                        pltpu.roll(x, shift=127, axis=1))

    d = partner - x                          # at even lanes: x1 - x0
    z = jnp.where(a < 0.0, -d, d)            # z = x_other - x_target
    # stable softplus(z) = logsumexp(x0, x1) - x_target
    nll = jnp.maximum(z, 0.0) + jnp.log(1.0 + jnp.exp(-jnp.abs(z)))
    w = jnp.abs(a)                           # per-sample class weight, 0 if masked
    contrib = jnp.where(w > 0.0, w * nll, 0.0)   # select (not multiply) kills garbage

    # Per-block partials: vreg-wise VPU adds only; the cross-lane reduction is
    # done on the tiny (grid, 8, 128) outputs in plain JAX.
    num_ref[0] = contrib.reshape(-1, 8, _LANES).sum(axis=0)
    den_ref[0] = w.reshape(-1, 8, _LANES).sum(axis=0)


def _bf16_exact(v):
    return float(np.asarray(v, dtype=jnp.bfloat16).astype(np.float32)) == float(v)


@functools.partial(jax.jit, static_argnames=("class_weight", "tile_rows"))
def weighted_cross_entropy(logits, target, *, class_weight, tile_rows=2048):
    """logits: (N, 2) float, target: (N,) int, class_weight: length-2 -> scalar loss."""
    n, c = logits.shape
    assert c == 2, "kernel is specialized for nc == 2"
    w0, w1 = float(class_weight[0]), float(class_weight[1])

    # ---- logits: free row-major reshape to (R, 128) -> 64 interleaved pairs/row.
    r_rows = pl.cdiv(2 * n, _LANES)
    flat = logits.reshape(-1)
    pad = r_rows * _LANES - 2 * n
    if pad:                                   # only copies when n % 64 != 0
        flat = jnp.pad(flat, (0, pad))
    x2 = flat.reshape(r_rows, _LANES)

    # ---- tiling: large streaming blocks; logits are never padded to the tile.
    t_rows = min(int(tile_rows), pl.cdiv(r_rows, _ROW_ALIGN) * _ROW_ALIGN)
    t_rows = max(_ROW_ALIGN, (t_rows // _ROW_ALIGN) * _ROW_ALIGN)
    grid = pl.cdiv(r_rows, t_rows)
    rows_full = grid * t_rows

    # ---- per-lane code: +w0 (t==0) / -w1 (t==1) at even lanes, 0 elsewhere.
    #      Only wrapper pass; covers the full grid extent so OOB rows mask to 0.
    a_dtype = jnp.bfloat16 if (_bf16_exact(w0) and _bf16_exact(w1)) else jnp.float32
    aw = jnp.where(target == 0, jnp.float32(w0), jnp.float32(-w1))
    a = jnp.stack([aw, jnp.zeros_like(aw)], axis=-1).reshape(-1)
    a = jnp.pad(a, (0, rows_full * _LANES - 2 * n))
    a2 = a.reshape(rows_full, _LANES).astype(a_dtype)

    num_p, den_p = pl.pallas_call(
        _wce_kernel,
        out_shape=(jax.ShapeDtypeStruct((grid, 8, _LANES), jnp.float32),
                   jax.ShapeDtypeStruct((grid, 8, _LANES), jnp.float32)),
        grid=(grid,),
        in_specs=[pl.BlockSpec((t_rows, _LANES), lambda i: (i, 0)),
                  pl.BlockSpec((t_rows, _LANES), lambda i: (i, 0))],
        out_specs=(pl.BlockSpec((1, 8, _LANES), lambda i: (i, 0, 0)),
                   pl.BlockSpec((1, 8, _LANES), lambda i: (i, 0, 0))),
        compiler_params=pltpu.CompilerParams(
            dimension_semantics=("parallel",)),   # megacore-shardable on v7x
    )(x2, a2)

    return num_p.sum() / den_p.sum()


class Loss:
    """JAX/Pallas port of utils/loss.py::Loss (CrossEntropyLoss(weight=[2, 1]))."""

    def __init__(self, hyp):
        self.hyp = hyp
        self.nc = hyp["nc"]
        self.weight = (2.0, 1.0)   # matches torch.tensor([2, 1])

    def __call__(self, output, target):
        return weighted_cross_entropy(output, target, class_weight=self.weight)


def _reference(logits, target, class_weight):
    logits = logits.astype(jnp.float32)
    lse = jax.nn.logsumexp(logits, axis=1)
    logit_t = jnp.take_along_axis(logits, target[:, None], axis=1)[:, 0]
    nll = lse - logit_t
    w = jnp.asarray(class_weight, dtype=jnp.float32)
    w_i = w[target]
    return jnp.sum(w_i * nll) / jnp.sum(w_i)


if __name__ == "__main__":
    key = jax.random.PRNGKey(0)

    # ---- small primary demo: N=8 samples, nc=2 classes ----
    k1, k2 = jax.random.split(key)
    N, C = 8, 2
    logits = jax.random.normal(k1, (N, C), dtype=jnp.float32)
    target = jax.random.randint(k2, (N,), 0, C, dtype=jnp.int32)

    loss_mod = Loss({"nc": C})
    loss = loss_mod(logits, target)
    jax.block_until_ready(loss)

    ref = _reference(logits, target, loss_mod.weight)
    assert np.allclose(np.asarray(loss), np.asarray(ref), rtol=1e-5, atol=1e-5), (
        loss, ref)

    # ---- multi-block check (exercises grid partials + tail masking) ----
    k3, k4 = jax.random.split(k2)
    N2 = 2500
    logits2 = jax.random.normal(k3, (N2, C), dtype=jnp.float32)
    target2 = jax.random.randint(k4, (N2,), 0, C, dtype=jnp.int32)
    loss2 = weighted_cross_entropy(logits2, target2,
                                   class_weight=loss_mod.weight, tile_rows=32)
    jax.block_until_ready(loss2)
    ref2 = _reference(logits2, target2, loss_mod.weight)
    assert np.allclose(np.asarray(loss2), np.asarray(ref2), rtol=1e-5, atol=1e-5), (
        loss2, ref2)

    print("KERNEL_OK")
</pallas_src>

<mosaic_0001>
module attributes {stable_mosaic.version = 11 : i64} {
  func.func @_wce_kernel(%arg0: i32, %arg1: memref<32x128xf32, #tpu.memory_space<vmem>>, %arg2: memref<32x128xbf16, #tpu.memory_space<vmem>>, %arg3: memref<1x8x128xf32, #tpu.memory_space<vmem>>, %arg4: memref<1x8x128xf32, #tpu.memory_space<vmem>>) attributes {dimension_semantics = [#tpu.dimension_semantics<parallel>], iteration_bounds = array<i64: 1>, scalar_prefetch = 0 : i64, scratch_operands = 0 : i64, tpu.core_type = #tpu.core_type<tc>, window_params = [{transform_indices = @transform_0, window_bounds = array<i64: 32, 128>}, {transform_indices = @transform_1, window_bounds = array<i64: 32, 128>}, {transform_indices = @transform_2, window_bounds = array<i64: 1, 8, 128>}, {transform_indices = @transform_3, window_bounds = array<i64: 1, 8, 128>}]} {
    %c0 = arith.constant 0 : index
    %c0_0 = arith.constant 0 : index
    %0 = vector.load %arg1[%c0, %c0_0] : memref<32x128xf32, #tpu.memory_space<vmem>>, vector<32x128xf32>
    %c0_1 = arith.constant 0 : index
    %c0_2 = arith.constant 0 : index
    %1 = vector.load %arg2[%c0_1, %c0_2] : memref<32x128xbf16, #tpu.memory_space<vmem>>, vector<32x128xbf16>
    %2 = arith.extf %1 : vector<32x128xbf16> to vector<32x128xf32>
    %3 = tpu.iota {dimensions = array<i32: 1>} : vector<1x128xi32>
    %c1_i32 = arith.constant 1 : i32
    %4 = tpu.dynamic_rotate %3 by %c1_i32 dim 1 : vector<1x128xi32>, i32 -> vector<1x128xi32>
    %c1_i32_3 = arith.constant 1 : i32
    %5 = vector.broadcast %c1_i32_3 : i32 to vector<1x128xi32>
    %6 = arith.addi %3, %5 : vector<1x128xi32>
    %7 = arith.cmpi eq, %4, %6 : vector<1x128xi32>
    %c1_i32_4 = arith.constant 1 : i32
    %8 = tpu.dynamic_rotate %0 by %c1_i32_4 dim 1 : vector<32x128xf32>, i32 -> vector<32x128xf32>
    %c127_i32 = arith.constant 127 : i32
    %9 = tpu.dynamic_rotate %0 by %c127_i32 dim 1 : vector<32x128xf32>, i32 -> vector<32x128xf32>
    %10 = vector.shape_cast %7 : vector<1x128xi1> to vector<1x128xi1>
    %11 = vector.broadcast %10 : vector<1x128xi1> to vector<32x128xi1>
    %12 = arith.select %11, %8, %9 : vector<32x128xi1>, vector<32x128xf32>
    %13 = arith.subf %12, %0 : vector<32x128xf32>
    %cst = arith.constant 0.000000e+00 : f32
    %14 = vector.broadcast %cst : f32 to vector<32x128xf32>
    %15 = arith.cmpf olt, %2, %14 : vector<32x128xf32>
    %cst_5 = arith.constant 0.000000e+00 : f32
    %16 = vector.broadcast %cst_5 : f32 to vector<32x128xf32>
    %17 = arith.subf %16, %13 : vector<32x128xf32>
    %18 = arith.select %15, %17, %13 : vector<32x128xi1>, vector<32x128xf32>
    %cst_6 = arith.constant 0.000000e+00 : f32
    %19 = vector.broadcast %cst_6 : f32 to vector<32x128xf32>
    %20 = arith.maximumf %18, %19 : vector<32x128xf32>
    %21 = math.absf %18 : vector<32x128xf32>
    %cst_7 = arith.constant 0.000000e+00 : f32
    %22 = vector.broadcast %cst_7 : f32 to vector<32x128xf32>
    %23 = arith.subf %22, %21 : vector<32x128xf32>
    %24 = math.exp %23 : vector<32x128xf32>
    %cst_8 = arith.constant 1.000000e+00 : f32
    %25 = vector.broadcast %cst_8 : f32 to vector<32x128xf32>
    %26 = arith.addf %25, %24 : vector<32x128xf32>
    %27 = math.log %26 : vector<32x128xf32>
    %28 = arith.addf %20, %27 : vector<32x128xf32>
    %29 = math.absf %2 : vector<32x128xf32>
    %cst_9 = arith.constant 0.000000e+00 : f32
    %30 = vector.broadcast %cst_9 : f32 to vector<32x128xf32>
    %31 = arith.cmpf ogt, %29, %30 : vector<32x128xf32>
    %32 = arith.mulf %29, %28 : vector<32x128xf32>
    %cst_10 = arith.constant 0.000000e+00 : f32
    %33 = vector.broadcast %cst_10 : f32 to vector<32x128xf32>
    %34 = arith.select %31, %32, %33 : vector<32x128xi1>, vector<32x128xf32>
    %35 = vector.shape_cast %34 : vector<32x128xf32> to vector<4x8x128xf32>
    %cst_11 = arith.constant dense<0.000000e+00> : vector<8x128xf32>
    %36 = vector.multi_reduction <add>, %35, %cst_11 [0] : vector<4x8x128xf32> to vector<8x128xf32>
    %c0_12 = arith.constant 0 : index
    %c0_13 = arith.constant 0 : index
    %c0_14 = arith.constant 0 : index
    %37 = vector.load %arg3[%c0_12, %c0_13, %c0_14] : memref<1x8x128xf32, #tpu.memory_space<vmem>>, vector<1x8x128xf32>
    %38 = vector.shape_cast %37 : vector<1x8x128xf32> to vector<8x128xf32>
    %39 = vector.shape_cast %36 : vector<8x128xf32> to vector<1x8x128xf32>
    tpu.vector_store %arg3[%c0_12, %c0_13, %c0_14], %39 {strides = array<i32>} : memref<1x8x128xf32, #tpu.memory_space<vmem>>, vector<1x8x128xf32>,
    %40 = vector.shape_cast %29 : vector<32x128xf32> to vector<4x8x128xf32>
    %cst_15 = arith.constant dense<0.000000e+00> : vector<8x128xf32>
    %41 = vector.multi_reduction <add>, %40, %cst_15 [0] : vector<4x8x128xf32> to vector<8x128xf32>
    %c0_16 = arith.constant 0 : index
    %c0_17 = arith.constant 0 : index
    %c0_18 = arith.constant 0 : index
    %42 = vector.load %arg4[%c0_16, %c0_17, %c0_18] : memref<1x8x128xf32, #tpu.memory_space<vmem>>, vector<1x8x128xf32>
    %43 = vector.shape_cast %42 : vector<1x8x128xf32> to vector<8x128xf32>
    %44 = vector.shape_cast %41 : vector<8x128xf32> to vector<1x8x128xf32>
    tpu.vector_store %arg4[%c0_16, %c0_17, %c0_18], %44 {strides = array<i32>} : memref<1x8x128xf32, #tpu.memory_space<vmem>>, vector<1x8x128xf32>,
    return
  }
  func.func @transform_0(%arg0: i32) -> (i32, i32) {
    %c0_i32 = arith.constant 0 : i32
    %c0_i32_0 = arith.constant 0 : i32
    return %arg0, %c0_i32 : i32, i32
  }
  func.func @transform_1(%arg0: i32) -> (i32, i32) {
    %c0_i32 = arith.constant 0 : i32
    %c0_i32_0 = arith.constant 0 : i32
    return %arg0, %c0_i32 : i32, i32
  }
  func.func @transform_2(%arg0: i32) -> (i32, i32, i32) {
    %c0_i32 = arith.constant 0 : i32
    %c0_i32_0 = arith.constant 0 : i32
    %c0_i32_1 = arith.constant 0 : i32
    return %arg0, %c0_i32, %c0_i32_0 : i32, i32, i32
  }
  func.func @transform_3(%arg0: i32) -> (i32, i32, i32) {
    %c0_i32 = arith.constant 0 : i32
    %c0_i32_0 = arith.constant 0 : i32
    %c0_i32_1 = arith.constant 0 : i32
    return %arg0, %c0_i32, %c0_i32_0 : i32, i32, i32
  }
}

</mosaic_0001>

<bundles_post_ra>
// kernel: weighted_cross_entropy.1
= control target key start
LH: loop header
LB: loop body
LE: loop exit
PB: predicated region body
PF: predicated region fallthrough
CT: control target
= control target key end

     0   :  { %v25_v0 = vlaneseq  ;;  %s169_s16 = smov 1   ;;  %s170_s17 = smov 127   ;;  %v171_v26 = vmov 0   ;;  %s240_s0 = inlined_call_operand.vmem [shape: f32[1,128], index: 0, kind: input, shape index: {}]   ;;  %s241_s1 = inlined_call_operand.vmem [shape: bf16[32,128], index: 1, kind: input, shape index: {}]   ;;  %s242_s3 = inlined_call_operand.vmem [shape: f32[1,8,128], index: 3, kind: output, shape index: {1}]   ;;  %s243_s2 = inlined_call_operand.vmem [shape: f32[1,8,128], index: 2, kind: output, shape index: {0}]  }
   0x1   :  { %v13_v1 = vld [vmem:[%s240_s0] sm:$0xff]  ;;  %v14_v2 = vld [vmem:[%s240_s0 + $0x8] sm:$0xff]  ;;  %v15_v4 = vld [vmem:[%s240_s0 + $0x10] sm:$0xff] }
   0x2   :  { %31 = vrot.lane.b32.xlu0 %v13_v1, %s169_s16  ;;  %33 = vrot.lane.b32.xlu1 %v14_v2, %s169_s16  ;;  %v26_v3 = vand.u32 127, %v25_v0  ;;  %v16_v5 = vld [vmem:[%s240_s0 + $0x18] sm:$0xff]  ;;  %v142_v6 = vld [vmem:[%s241_s1] sm:$0xff]   ;;  %v49_v19 = vshrl.u32 %v25_v0, 7 }
   0x3   :  { %v143_v7 = vunpack.c.l.bf16 %v142_v6  ;;  %v144_v8 = vunpack.c.h.bf16 %v142_v6  ;;  %v149_v9 = vld [vmem:[%s241_s1 + $0x8] sm:$0xff]  }
   0x4   :  { %v147_v12 = vunpack.c.l.bf16 %v149_v9  ;;  %v148_v16 = vunpack.c.h.bf16 %v149_v9  ;;  %v29_v22 = vadd.s32 1, %v26_v3  ;;  %v50_v23 = vsub.s32 0, %v49_v19 }
   0x5   :  { %v210_v10 = vand.u32 2147483647, %v143_v7  ;;  %v212_v11 = vand.u32 2147483647, %v144_v8  ;;  %vm61_vm2 = vcmp.lt.f32.partialorder %v143_v7, 0.0  ;;  %vm62_vm3 = vcmp.lt.f32.partialorder %v144_v8, 0.0 }
   0x6   :  { %27 = vrot.lane.b32.xlu0 %v26_v3, %s169_s16  ;;  %39 = vrot.lane.b32.xlu1 %v13_v1, %s170_s17  ;;  %v216_v14 = vand.u32 2147483647, %v147_v12  ;;  %v219_v17 = vand.u32 2147483647, %v148_v16  ;;  %vm63_vm4 = vcmp.lt.f32.partialorder %v147_v12, 0.0  ;;  %vm64_vm5 = vcmp.lt.f32.partialorder %v148_v16, 0.0 }
   0x7   :  { %v129_v13 = vadd.f32 %v212_v11, %v210_v10  ;;  %vm113_vm6 = vcmp.gt.f32.partialorder %v210_v10, 0.0  ;;  %vm114_vm7 = vcmp.gt.f32.partialorder %v212_v11, 0.0 }
   0x8   :  { %vm115_vm8 = vcmp.gt.f32.partialorder %v216_v14, 0.0  ;;  %vm116_vm9 = vcmp.gt.f32.partialorder %v219_v17, 0.0 }
   0x9   :  { %v130_v15 = vadd.f32 %v129_v13, %v216_v14 }
   0xa   :  { %41 = vrot.lane.b32.xlu0 %v14_v2, %s170_s17  ;;  %35 = vrot.lane.b32.xlu1 %v15_v4, %s169_s16 }
   0xb   :  { %v131_v18 = vadd.f32 %v130_v15, %v219_v17 }
   0xd   :  { %132 = vst [vmem:[%s242_s3] sm:$0xff] %v131_v18 }
   0xe   :  { %43 = vrot.lane.b32.xlu0 %v15_v4, %s170_s17  ;;  %37 = vrot.lane.b32.xlu1 %v16_v5, %s169_s16 }
  0x12   :  { %45 = vrot.lane.b32.xlu0 %v16_v5, %s170_s17 }
  0x74   :  { %v32_v20 = vpop.permute.xlu0 %31  ;;  %v34_v21 = vpop.permute.xlu1 %33 }
  0x78   :  { %v28_v24 = vpop.permute.xlu0 %27  ;;  %v40_v25 = vpop.permute.xlu1 %39 }
  0x79   :  { %vm30_vm0 = vcmp.eq.s32.totalorder %v28_v24, %v29_v22 }
  0x7a   :  { %v47_v27 = vsel %vm30_vm0, 1, %v171_v26 }
  0x7b   :  { %v51_v28 = vrot.slane %v47_v27, %v50_v23 }
  0x7c   :  { %v42_v29 = vpop.permute.xlu0 %41  ;;  %v36_v30 = vpop.permute.xlu1 %35 }
  0x7d   :  { %vm52_vm1 = vcmp.eq.s32.totalorder %v51_v28, 1 }
  0x7e   :  { %v53_v31 = vsel %vm52_vm1, %v32_v20, %v40_v25  ;;  %v54_v32 = vsel %vm52_vm1, %v34_v21, %v42_v29 }
  0x7f   :  { %v57_v33 = vsub.f32 %v53_v31, %v13_v1  ;;  %v58_v34 = vsub.f32 %v54_v32, %v14_v2 }
  0x80   :  { %v44_v35 = vpop.permute.xlu0 %43  ;;  %v38_v40 = vpop.permute.xlu1 %37 }
  0x81   :  { %v65_v36 = vsub.f32 0.0, %v57_v33  ;;  %v66_v37 = vsub.f32 0.0, %v58_v34  ;;  %v55_v38 = vsel %vm52_vm1, %v36_v30, %v44_v35 }
  0x82   :  { %v59_v39 = vsub.f32 %v55_v38, %v15_v4 }
  0x83   :  { %v69_v41 = vsel %vm61_vm2, %v65_v36, %v57_v33  ;;  %v70_v42 = vsel %vm62_vm3, %v66_v37, %v58_v34 }
  0x84   :  { %v77_v43 = vand.u32 2147483647, %v69_v41  ;;  %v78_v44 = vand.u32 2147483647, %v70_v42  ;;  %v46_v45 = vpop.permute.xlu0 %45  ;;  %v67_v46 = vsub.f32 0.0, %v59_v39  ;;  %v73_v8 = vmax.f32 %v69_v41, 0.0 }
  0x85   :  { %v56_v47 = vsel %vm52_vm1, %v38_v40, %v46_v45  ;;  %v74_v12 = vmax.f32 %v70_v42, 0.0 }
  0x86   :  { %v81_v48 = vsub.f32 0.0, %v77_v43  ;;  %v82_v49 = vsub.f32 0.0, %v78_v44  ;;  %v60_v50 = vsub.f32 %v56_v47, %v16_v5  ;;  %v71_v51 = vsel %vm63_vm4, %v67_v46, %v59_v39 }
  0x87   :  { %v79_v55 = vand.u32 2147483647, %v71_v51  ;;  %v75_v21 = vmax.f32 %v71_v51, 0.0 }
  0x88   :  { %v85_v52 = vmul.f32 1.442695, %v81_v48  ;;  %v87_v53 = vmul.f32 1.442695, %v82_v49  ;;  %v68_v54 = vsub.f32 0.0, %v60_v50 }
  0x89   :  { %v83_v57 = vsub.f32 0.0, %v79_v55 }
  0x8a   :  { %153 = vpow2.f32 %v85_v52  ;;  %v72_v56 = vsel %vm64_vm5, %v68_v54, %v60_v50 }
  0x8b   :  { %155 = vpow2.f32 %v87_v53  ;;  %v80_v58 = vand.u32 2147483647, %v72_v56  ;;  %v89_v59 = vmul.f32 1.442695, %v83_v57  ;;  %v76_v27 = vmax.f32 %v72_v56, 0.0 }
  0x8d   :  { %v84_v60 = vsub.f32 0.0, %v80_v58  ;;  %157 = vpow2.f32 %v89_v59 }
  0x8f   :  { %v91_v61 = vmul.f32 1.442695, %v84_v60 }
  0x91   :  { %159 = vpow2.f32 %v91_v61 }
  0x94   :  { %v154_v62 = vpop.eup %153 }
  0x95   :  { %v156_v63 = vpop.eup %155  ;;  %v93_v0 = vadd.f32 1.0, %v154_v62 }
  0x96   :  { %v94_v1 = vadd.f32 1.0, %v156_v63 }
  0x97   :  { %161 = vlog2.f32 %v93_v0  ;;  %v158_v2 = vpop.eup %157 }
  0x98   :  { %163 = vlog2.f32 %v94_v1  ;;  %v95_v3 = vadd.f32 1.0, %v158_v2 }
  0x9a   :  { %165 = vlog2.f32 %v95_v3 }
  0x9b   :  { %v160_v4 = vpop.eup %159 }
  0x9c   :  { %v96_v5 = vadd.f32 1.0, %v160_v4 }
  0x9e   :  { %167 = vlog2.f32 %v96_v5 }
  0xa1   :  { %v162_v6 = vpop.eup %161 }
  0xa2   :  { %v164_v7 = vpop.eup %163  ;;  %v98_v9 = vmul.f32 0.6931472, %v162_v6 }
  0xa3   :  { %v100_v13 = vmul.f32 0.6931472, %v164_v7 }
  0xa4   :  { %v105_v15 = vadd.f32 %v98_v9, %v73_v8  ;;  %v166_v18 = vpop.eup %165 }
  0xa5   :  { %v106_v16 = vadd.f32 %v100_v13, %v74_v12  ;;  %v102_v22 = vmul.f32 0.6931472, %v166_v18 }
  0xa6   :  { %v117_v19 = vmul.f32 %v210_v10, %v105_v15 }
  0xa7   :  { %v118_v20 = vmul.f32 %v212_v11, %v106_v16  ;;  %v107_v26 = vadd.f32 %v102_v22, %v75_v21 }
  0xa8   :  { %v168_v23 = vpop.eup %167  ;;  %v121_v24 = vsel %vm113_vm6, %v117_v19, 0.0 }
  0xa9   :  { %v122_v25 = vsel %vm114_vm7, %v118_v20, 0.0  ;;  %v104_v28 = vmul.f32 0.6931472, %v168_v23  ;;  %v119_v30 = vmul.f32 %v216_v14, %v107_v26 }
  0xaa   :  { %v125_v29 = vadd.f32 %v122_v25, %v121_v24 }
  0xab   :  { %v108_v31 = vadd.f32 %v104_v28, %v76_v27  ;;  %v123_v10 = vsel %vm115_vm8, %v119_v30, 0.0 }
  0xac   :  { %v126_v11 = vadd.f32 %v125_v29, %v123_v10 }
  0xad   :  { %v120_v32 = vmul.f32 %v219_v17, %v108_v31 }
  0xaf   :  { %v124_v33 = vsel %vm116_vm9, %v120_v32, 0.0 }
  0xb0   :  { %v127_v34 = vadd.f32 %v126_v11, %v124_v33 }
  0xb2   :  { %128 = vst [vmem:[%s243_s2] sm:$0xff] %v127_v34 }

</bundles_post_ra>
